<compile_context>
chip_gen: v7x
topology: tpu7x:2x2x1
jax: 0.10.0
libtpu: 0.0.40
codegen_flags: <defaults>
</compile_context>

<pallas_src>
from functools import partial

import numpy as np
import jax
import jax.numpy as jnp
from jax.experimental import pallas as pl
from jax.experimental.pallas import tpu as pltpu

_LANE = 128
_SUBLANE = 8
_VMEM_TARGET = 3 * 1024 * 1024      # per-step input block (VMEM-padded bytes)
_VMEM_LIMIT = 32 * 1024 * 1024      # scoped-VMEM budget, safe on v5e/v6e/v7x


def _round_up(x, m):
    return ((x + m - 1) // m) * m


def _pair(v):
    return (v, v) if isinstance(v, int) else tuple(v)


def _pad_value(dtype, pool_type):
    # avg: pad with 0 and divide by kh*kw (PyTorch count_include_pad=True).
    if pool_type == "avg":
        return 0
    if jnp.issubdtype(dtype, jnp.floating):
        return float(jnp.finfo(dtype).min)
    if jnp.issubdtype(dtype, jnp.integer):
        return int(jnp.iinfo(dtype).min)
    raise TypeError(f"unsupported dtype for padded max pooling: {dtype}")


# ---------------------------------------------------------------------------
# Fused fast-path kernels (stride == kernel).
# Input block:  (TP, TOH, kh, L) with L = Wp * C  (kh, L are full array dims).
# Output block: (TP, TOH, OW * C).
# ---------------------------------------------------------------------------
def _h_tap_reduce(x_ref, kh, avg):
    """Reduce the kh height taps with per-tap loads (f32 accumulation for avg)."""
    acc = None
    for i in range(kh):
        tap = x_ref[:, :, i, :]
        if avg:
            tap = tap.astype(jnp.float32)
            acc = tap if acc is None else acc + tap
        else:
            acc = tap if acc is None else jnp.maximum(acc, tap)
    return acc                                     # (TP, TOH, L)


def _fused_mxu_kernel(x_ref, sel_ref, o_ref, *, pool_type, kh, inv_k):
    """Width reduction / compaction via 0/1 selection matmuls on the MXU."""
    avg = pool_type == "avg"
    acc = _h_tap_reduce(x_ref, kh, avg)
    n_sel = sel_ref.shape[0]
    sels = [sel_ref[j] for j in range(n_sel)]      # (L, OW*C) f32 each
    for p in range(acc.shape[0]):                  # small unrolled 2-D matmuls
        a2 = acc[p].astype(jnp.float32)            # (TOH, L)
        red = None
        for j in range(n_sel):
            r = jnp.dot(a2, sels[j], preferred_element_type=jnp.float32)
            if red is None:
                red = r
            else:
                red = red + r if avg else jnp.maximum(red, r)
        if avg:
            red = red * inv_k
        o_ref[p] = red.astype(o_ref.dtype)


def _fused_slice_kernel(x_ref, o_ref, *, pool_type, kh, kw, C, OW, inv_k):
    """Width reduction via static, contiguous lane slices (large OW*C)."""
    avg = pool_type == "avg"
    acc = _h_tap_reduce(x_ref, kh, avg)            # (TP, TOH, L)
    for ow in range(OW):
        seg = None
        for j in range(kw):
            lo = (ow * kw + j) * C
            s = acc[:, :, lo:lo + C]
            if seg is None:
                seg = s
            else:
                seg = seg + s if avg else jnp.maximum(seg, s)
        if avg:
            seg = seg * inv_k
        o_ref[:, :, ow * C:(ow + 1) * C] = seg.astype(o_ref.dtype)


def _choose_tiles(P, OH, kh, L, itembytes):
    """Pick (TP, TOH) so a step is ~_VMEM_TARGET bytes and the grid has >=2 steps."""
    # VMEM-padded bytes of one (p, oh) input row: a (kh, L) tile rounded to (8,128).
    row_bytes = _round_up(kh, _SUBLANE) * _round_up(L, _LANE) * itembytes
    max_rows = max(1, _VMEM_TARGET // row_bytes)
    if OH <= max_rows:
        toh = OH                                   # == full dim (always legal)
        tp = max(1, min(P, max_rows // max(OH, 1)))
    else:
        toh = min(OH, max(_SUBLANE, (max_rows // _SUBLANE) * _SUBLANE))
        tp = 1
    # v7x has two TensorCores: make sure the parallel grid has >= 2 steps.
    if pl.cdiv(P, tp) * pl.cdiv(OH, toh) < 2:
        if P >= 2:
            tp = pl.cdiv(P, 2)
        elif OH >= 2 * _SUBLANE:
            toh = max(_SUBLANE, (pl.cdiv(OH, 2) // _SUBLANE) * _SUBLANE)
    tp = min(tp, 64)   # bound the per-block unrolled matmul loop
    return tp, toh


def _pool_fused(xv, pool_type, kh, kw, OH, OW):
    """Fused pooling of xv = (P, Hp, Wp, C), Hp == OH*kh, stride == kernel."""
    P, Hp, Wp, C = xv.shape
    L = Wp * C
    OWC = OW * C
    dtype = xv.dtype
    x4 = xv.reshape(P, OH, kh, L)                  # free view, no HBM copy

    n_sel = kw if pool_type == "max" else 1
    inv_k = 1.0 / float(kh * kw)
    # MXU selection stays essentially free only while OW*C is small; otherwise
    # use the static-lane-slice kernel.  Integer max pooling avoids the MXU so
    # values never round-trip through f32.
    use_mxu = (OWC * n_sel <= 128 * kh
               and n_sel * L * OWC * 4 <= (2 << 20)
               and (pool_type == "avg" or jnp.issubdtype(dtype, jnp.floating)))

    itembytes = max(dtype.itemsize, 4)             # f32 accumulator dominates
    TP, TOH = _choose_tiles(P, OH, kh, L, itembytes)
    grid = (pl.cdiv(P, TP), pl.cdiv(OH, TOH))

    in_specs = [pl.BlockSpec((TP, TOH, kh, L), lambda p, o: (p, o, 0, 0))]
    operands = [x4]
    if use_mxu:
        sel = np.zeros((n_sel, L, OWC), np.float32)
        for ow in range(OW):
            for j in range(kw):
                for c in range(C):
                    sel[j if pool_type == "max" else 0,
                        (ow * kw + j) * C + c, ow * C + c] = 1.0
        in_specs.append(pl.BlockSpec((n_sel, L, OWC), lambda p, o: (0, 0, 0)))
        operands.append(jnp.asarray(sel))
        kernel = partial(_fused_mxu_kernel, pool_type=pool_type, kh=kh,
                         inv_k=inv_k)
        flops = 2 * P * OH * L * OWC * n_sel + P * OH * kh * L
    else:
        kernel = partial(_fused_slice_kernel, pool_type=pool_type, kh=kh,
                         kw=kw, C=C, OW=OW, inv_k=inv_k)
        flops = P * OH * (kh + kw) * L

    out = pl.pallas_call(
        kernel,
        out_shape=jax.ShapeDtypeStruct((P, OH, OWC), dtype),
        grid=grid,
        in_specs=in_specs,
        out_specs=pl.BlockSpec((TP, TOH, OWC), lambda p, o: (p, o, 0)),
        compiler_params=pltpu.CompilerParams(
            dimension_semantics=("parallel", "parallel"),
            vmem_limit_bytes=_VMEM_LIMIT),
        cost_estimate=pl.CostEstimate(
            flops=int(flops),
            transcendentals=0,
            bytes_accessed=int(x4.size * dtype.itemsize
                               + P * OH * OWC * dtype.itemsize)),
    )(*operands)
    return out.reshape(P, OH, OW, C)


# ---------------------------------------------------------------------------
# Generic fallback path (stride != kernel, non-adjacent pool axes, ...).
# Gathers the kh*kw window taps with XLA and reduces them in a lane-dense
# (K, R, 512) Pallas layout.  Correctness-oriented; not the hot path.
# ---------------------------------------------------------------------------
def _tap_reduce_kernel(w_ref, o_ref, *, pool_type, inv_k):
    K = w_ref.shape[0]
    avg = pool_type == "avg"
    acc = None
    for i in range(K):                             # per-tap f32 accumulation
        tap = w_ref[i]
        if avg:
            tap = tap.astype(jnp.float32)
            acc = tap if acc is None else acc + tap
        else:
            acc = tap if acc is None else jnp.maximum(acc, tap)
    if avg:
        acc = acc * inv_k
    o_ref[...] = acc.astype(o_ref.dtype)


def _reduce_taps_pallas(win, pool_type, k_total):
    K, M = win.shape
    CB = 4 * _LANE
    Mp = _round_up(M, CB)
    if Mp != M:
        win = jnp.pad(win, ((0, 0), (0, Mp - M)))
    R = Mp // CB
    win3 = win.reshape(K, R, CB)
    TR = R if R <= 128 else 128
    out = pl.pallas_call(
        partial(_tap_reduce_kernel, pool_type=pool_type,
                inv_k=1.0 / float(k_total)),
        out_shape=jax.ShapeDtypeStruct((R, CB), win.dtype),
        grid=(pl.cdiv(R, TR),),
        in_specs=[pl.BlockSpec((K, TR, CB), lambda r: (0, r, 0))],
        out_specs=pl.BlockSpec((TR, CB), lambda r: (r, 0)),
        compiler_params=pltpu.CompilerParams(
            dimension_semantics=("parallel",),
            vmem_limit_bytes=_VMEM_LIMIT),
        cost_estimate=pl.CostEstimate(
            flops=int(K * R * CB), transcendentals=0,
            bytes_accessed=int((K + 1) * R * CB * win.dtype.itemsize)),
    )(win3)
    return out.reshape(Mp)[:M]


def _pool_fallback(x, pool_type, kh, kw, sh, sw, ph, pw, a0, a1):
    ndim = x.ndim
    others = [d for d in range(ndim) if d not in (a0, a1)]
    perm = others + [a0, a1]
    xm = jnp.transpose(x, perm)                    # (*rest, H, W)
    rest = xm.shape[:-2]
    H, W = xm.shape[-2], xm.shape[-1]
    if ph or pw:
        pad_val = _pad_value(x.dtype, pool_type)
        cfg = [(0, 0)] * (ndim - 2) + [(ph, ph), (pw, pw)]
        xm = jnp.pad(xm, cfg, constant_values=pad_val)
    Hp, Wp = H + 2 * ph, W + 2 * pw
    OH = (Hp - kh) // sh + 1
    OW = (Wp - kw) // sw + 1
    taps = []
    for i in range(kh):
        for j in range(kw):
            taps.append(xm[..., i:i + (OH - 1) * sh + 1:sh,
                              j:j + (OW - 1) * sw + 1:sw])
    win = jnp.stack(taps, axis=0).reshape(kh * kw, -1)
    red = _reduce_taps_pallas(win, pool_type, kh * kw)
    out_moved = red.reshape(*rest, OH, OW)
    inv = [perm.index(k) for k in range(ndim)]
    return jnp.transpose(out_moved, inv)


# ---------------------------------------------------------------------------
# Public wrapper: speechbrain.nnet.pooling.Pooling2d.forward semantics.
# ---------------------------------------------------------------------------
def pooling2d(x, pool_type, kernel_size, pool_axis=(1, 2),
              ceil_mode=False, padding=0, dilation=1, stride=None):
    """JAX/Pallas equivalent of speechbrain.nnet.pooling.Pooling2d.forward."""
    assert pool_type in ("avg", "max")
    if ceil_mode:
        # TODO(synk): ceil_mode=True output-shape rounding not implemented.
        raise NotImplementedError("ceil_mode=True not supported")
    # NOTE: like the reference module, `dilation` is stored but never forwarded
    # to the torch pool layer, so it is intentionally ignored here as well.
    del dilation

    kh, kw = _pair(kernel_size)
    sh, sw = (kh, kw) if stride is None else _pair(stride)
    ph, pw = _pair(padding)
    if ph > kh // 2 or pw > kw // 2:
        # Mirrors torch's "pad should be at most half of kernel size" check.
        raise ValueError("padding should be at most half of the kernel size")

    ndim = x.ndim
    a0, a1 = (int(a) % ndim for a in pool_axis)

    # Fast, fully fused path: adjacent pool axes and stride == kernel (the
    # SpeechBrain default); requires the (padded) height to split exactly into
    # OH * kh so the windowed view is a free reshape.
    if a0 + 1 == a1 and sh == kh and sw == kw:
        P = int(np.prod(x.shape[:a0], dtype=np.int64))
        C = int(np.prod(x.shape[a1 + 1:], dtype=np.int64))
        H, W = x.shape[a0], x.shape[a1]
        xv = x.reshape(P, H, W, C)                 # free view, no transpose
        if ph or pw:
            pad_val = _pad_value(x.dtype, pool_type)
            xv = jnp.pad(xv, ((0, 0), (ph, ph), (pw, pw), (0, 0)),
                         constant_values=pad_val)
        Hp, Wp = H + 2 * ph, W + 2 * pw
        OH = (Hp - kh) // kh + 1 if Hp >= kh else 0
        OW = (Wp - kw) // kw + 1 if Wp >= kw else 0
        if OH > 0 and OW > 0 and Hp == OH * kh:
            out4 = _pool_fused(xv, pool_type, kh, kw, OH, OW)
            return out4.reshape(x.shape[:a0] + (OH, OW) + x.shape[a1 + 1:])

    return _pool_fallback(x, pool_type, kh, kw, sh, sw, ph, pw, a0, a1)


if __name__ == "__main__":
    key = jax.random.PRNGKey(0)
    k1, k2, k3, k4 = jax.random.split(key, 4)

    # 1) 4-D channels-last (batch, time, freq, channels); max pool (4,3).
    #    Exercises the fused MXU-selection path with C > 1.
    x4 = jax.random.normal(k1, (2, 16, 12, 4), dtype=jnp.float32)
    y4 = jax.block_until_ready(pooling2d(x4, "max", (4, 3), pool_axis=(1, 2)))
    ref4 = jnp.max(x4.reshape(2, 4, 4, 4, 3, 4), axis=(2, 4))
    assert y4.shape == (2, 4, 4, 4), y4.shape
    assert jnp.allclose(y4, ref4), "max pooling (4-D) mismatch"

    # 2) 3-D docstring example: (10, 15, 12), kernel (5, 3) -> (10, 3, 4); avg.
    x3 = jax.random.uniform(k2, (10, 15, 12), dtype=jnp.float32)
    y3 = jax.block_until_ready(pooling2d(x3, "avg", (5, 3), pool_axis=(1, 2)))
    ref3 = jnp.mean(x3.reshape(10, 3, 5, 4, 3), axis=(2, 4))
    assert y3.shape == (10, 3, 4), y3.shape
    assert jnp.allclose(y3, ref3, atol=1e-6), "avg pooling (3-D) mismatch"

    # 3) Wide-channel 4-D input: exercises the fused static-lane-slice path.
    xc = jax.random.normal(k3, (2, 8, 6, 160), dtype=jnp.float32)
    yc = jax.block_until_ready(pooling2d(xc, "max", (2, 3), pool_axis=(1, 2)))
    refc = jnp.max(xc.reshape(2, 4, 2, 2, 3, 160), axis=(2, 4))
    assert yc.shape == (2, 4, 2, 160), yc.shape
    assert jnp.allclose(yc, refc), "max pooling (wide channels) mismatch"

    # 4) stride != kernel -> generic fallback path (avg pooling).
    xf = jax.random.uniform(k4, (4, 9, 10), dtype=jnp.float32)
    yf = jax.block_until_ready(
        pooling2d(xf, "avg", (2, 2), pool_axis=(1, 2), stride=(2, 3)))
    reff = jnp.stack(
        [jnp.stack([xf[:, 2 * oh:2 * oh + 2, 3 * ow:3 * ow + 2].mean(axis=(1, 2))
                    for ow in range(3)], axis=-1) for oh in range(4)], axis=1)
    assert yf.shape == (4, 4, 3), yf.shape
    assert jnp.allclose(yf, reff, atol=1e-6), "avg pooling (fallback) mismatch"

    print("KERNEL_OK")
</pallas_src>

<mosaic_0001>
module attributes {stable_mosaic.version = 11 : i64} {
  func.func @_fused_mxu_kernel(%arg0: i32, %arg1: i32, %arg2: memref<1x4x4x48xf32, #tpu.memory_space<vmem>>, %arg3: memref<3x48x16xf32, #tpu.memory_space<vmem>>, %arg4: memref<1x4x16xf32, #tpu.memory_space<vmem>>) attributes {dimension_semantics = [#tpu.dimension_semantics<parallel>, #tpu.dimension_semantics<parallel>], iteration_bounds = array<i64: 2, 1>, scalar_prefetch = 0 : i64, scratch_operands = 0 : i64, tpu.core_type = #tpu.core_type<tc>, window_params = [{transform_indices = @transform_0, window_bounds = array<i64: 1, 4, 4, 48>}, {pipeline_mode = #tpu.pipeline_mode<synchronous>, transform_indices = @transform_1, window_bounds = array<i64: 3, 48, 16>}, {transform_indices = @transform_2, window_bounds = array<i64: 1, 4, 16>}]} {
    %c0 = arith.constant 0 : index
    %c0_0 = arith.constant 0 : index
    %c0_1 = arith.constant 0 : index
    %c0_2 = arith.constant 0 : index
    %0 = vector.load %arg2[%c0, %c0_0, %c0_1, %c0_2] : memref<1x4x4x48xf32, #tpu.memory_space<vmem>>, vector<1x4x1x48xf32>
    %1 = vector.shape_cast %0 : vector<1x4x1x48xf32> to vector<1x4x48xf32>
    %c0_3 = arith.constant 0 : index
    %c0_4 = arith.constant 0 : index
    %c1 = arith.constant 1 : index
    %c0_5 = arith.constant 0 : index
    %2 = vector.load %arg2[%c0_3, %c0_4, %c1, %c0_5] : memref<1x4x4x48xf32, #tpu.memory_space<vmem>>, vector<1x4x1x48xf32>
    %3 = vector.shape_cast %2 : vector<1x4x1x48xf32> to vector<1x4x48xf32>
    %4 = arith.maximumf %1, %3 : vector<1x4x48xf32>
    %c0_6 = arith.constant 0 : index
    %c0_7 = arith.constant 0 : index
    %c2 = arith.constant 2 : index
    %c0_8 = arith.constant 0 : index
    %5 = vector.load %arg2[%c0_6, %c0_7, %c2, %c0_8] : memref<1x4x4x48xf32, #tpu.memory_space<vmem>>, vector<1x4x1x48xf32>
    %6 = vector.shape_cast %5 : vector<1x4x1x48xf32> to vector<1x4x48xf32>
    %7 = arith.maximumf %4, %6 : vector<1x4x48xf32>
    %c0_9 = arith.constant 0 : index
    %c0_10 = arith.constant 0 : index
    %c3 = arith.constant 3 : index
    %c0_11 = arith.constant 0 : index
    %8 = vector.load %arg2[%c0_9, %c0_10, %c3, %c0_11] : memref<1x4x4x48xf32, #tpu.memory_space<vmem>>, vector<1x4x1x48xf32>
    %9 = vector.shape_cast %8 : vector<1x4x1x48xf32> to vector<1x4x48xf32>
    %10 = arith.maximumf %7, %9 : vector<1x4x48xf32>
    %c0_12 = arith.constant 0 : index
    %c0_13 = arith.constant 0 : index
    %c0_14 = arith.constant 0 : index
    %11 = vector.load %arg3[%c0_12, %c0_13, %c0_14] : memref<3x48x16xf32, #tpu.memory_space<vmem>>, vector<1x48x16xf32>
    %12 = vector.shape_cast %11 : vector<1x48x16xf32> to vector<48x16xf32>
    %c1_15 = arith.constant 1 : index
    %c0_16 = arith.constant 0 : index
    %c0_17 = arith.constant 0 : index
    %13 = vector.load %arg3[%c1_15, %c0_16, %c0_17] : memref<3x48x16xf32, #tpu.memory_space<vmem>>, vector<1x48x16xf32>
    %14 = vector.shape_cast %13 : vector<1x48x16xf32> to vector<48x16xf32>
    %c2_18 = arith.constant 2 : index
    %c0_19 = arith.constant 0 : index
    %c0_20 = arith.constant 0 : index
    %15 = vector.load %arg3[%c2_18, %c0_19, %c0_20] : memref<3x48x16xf32, #tpu.memory_space<vmem>>, vector<1x48x16xf32>
    %16 = vector.shape_cast %15 : vector<1x48x16xf32> to vector<48x16xf32>
    %17 = vector.shape_cast %10 : vector<1x4x48xf32> to vector<4x48xf32>
    %cst = arith.constant dense<0.000000e+00> : vector<4x16xf32>
    %18 = tpu.matmul %17, %12, %cst {dimension_numbers = #tpu.dot_dimension_numbers<[1], [0], [0], [1], [0, 0, 1, 1], [], []>} : vector<4x48xf32>, vector<48x16xf32>, vector<4x16xf32> -> vector<4x16xf32>
    %cst_21 = arith.constant dense<0.000000e+00> : vector<4x16xf32>
    %19 = tpu.matmul %17, %14, %cst_21 {dimension_numbers = #tpu.dot_dimension_numbers<[1], [0], [0], [1], [0, 0, 1, 1], [], []>} : vector<4x48xf32>, vector<48x16xf32>, vector<4x16xf32> -> vector<4x16xf32>
    %20 = arith.maximumf %18, %19 : vector<4x16xf32>
    %cst_22 = arith.constant dense<0.000000e+00> : vector<4x16xf32>
    %21 = tpu.matmul %17, %16, %cst_22 {dimension_numbers = #tpu.dot_dimension_numbers<[1], [0], [0], [1], [0, 0, 1, 1], [], []>} : vector<4x48xf32>, vector<48x16xf32>, vector<4x16xf32> -> vector<4x16xf32>
    %22 = arith.maximumf %20, %21 : vector<4x16xf32>
    %c0_23 = arith.constant 0 : index
    %c0_24 = arith.constant 0 : index
    %c0_25 = arith.constant 0 : index
    %23 = vector.load %arg4[%c0_23, %c0_24, %c0_25] : memref<1x4x16xf32, #tpu.memory_space<vmem>>, vector<1x4x16xf32>
    %24 = vector.shape_cast %23 : vector<1x4x16xf32> to vector<4x16xf32>
    %25 = vector.shape_cast %22 : vector<4x16xf32> to vector<1x4x16xf32>
    tpu.vector_store %arg4[%c0_23, %c0_24, %c0_25], %25 {strides = array<i32>} : memref<1x4x16xf32, #tpu.memory_space<vmem>>, vector<1x4x16xf32>,
    return
  }
  func.func @transform_0(%arg0: i32, %arg1: i32) -> (i32, i32, i32, i32) {
    %c0_i32 = arith.constant 0 : i32
    %c0_i32_0 = arith.constant 0 : i32
    %c0_i32_1 = arith.constant 0 : i32
    return %arg0, %arg1, %c0_i32, %c0_i32_0 : i32, i32, i32, i32
  }
  func.func @transform_1(%arg0: i32, %arg1: i32) -> (i32, i32, i32) {
    %c0_i32 = arith.constant 0 : i32
    %c0_i32_0 = arith.constant 0 : i32
    %c0_i32_1 = arith.constant 0 : i32
    %c0_i32_2 = arith.constant 0 : i32
    return %c0_i32, %c0_i32_0, %c0_i32_1 : i32, i32, i32
  }
  func.func @transform_2(%arg0: i32, %arg1: i32) -> (i32, i32, i32) {
    %c0_i32 = arith.constant 0 : i32
    %c0_i32_0 = arith.constant 0 : i32
    return %arg0, %arg1, %c0_i32 : i32, i32, i32
  }
}

</mosaic_0001>

<bundles_post_ra>
// kernel: tpu_custom_call.1
= control target key start
LH: loop header
LB: loop body
LE: loop exit
PB: predicated region body
PF: predicated region fallthrough
CT: control target
= control target key end

     0   :  { %7 = vsyncpa [#allocation3], 0  ;;  %s1019_s0 = inlined_call_operand.vmem [shape: f32[2,4,4,48], index: 0, kind: input, shape index: {}]   ;;  %s1020_s1 = inlined_call_operand.vmem [shape: f32[3,48,16], index: 1, kind: input, shape index: {}]   ;;  %s1021_s2 = inlined_call_operand.hbm [shape: f32[2,4,16], index: 2, kind: output, shape index: {}]  }
   0x1   :  { %9 = vsyncpa [#allocation3 + $0x1], 0  ;;  %s817_s9 = smov 0   ;;  %s819_s10 = smov 0  }
   0x2   :  { %s821_s11 = smov 0   ;;  %s823_s12 = smov 0  }
   0x3   :  { %s825_s13 = smov 0   ;;  %s827_s14 = smov 0  }
   0x4 LB: > { %s539_s15 = sadd.s32 4294967295, %s796_s14   ;;  %s540_s16 = sadd.s32 4294967294, %s796_s14   ;;  %s796_s14 = sphi %s827_s14, %s15_s14   ;;  %s792_s13 = sphi %s825_s13, %s1028_s13   ;;  %s788_s12 = sphi %s823_s12, %s1027_s12   ;;  %s784_s11 = sphi %s821_s11, %s1026_s11   ;;  %s780_s10 = sphi %s819_s10, %s1025_s10   ;;  %s776_s9 = sphi %s817_s9, %s1024_s9  }
   0x5   : > { %s27_s17 = sadd.s32 1, %s792_s13  ;;  %s85_s18 = sadd.s32 1, %s784_s11 }
   0x6   : > { %p29_p0 = scmp.ge.s32.totalorder %s27_s17, 2  ;;  %p95_p1 = scmp.ne.s32.totalorder %s784_s11, %s780_s10 }
   0x7   : > { %p96_p2 = scmp.eq.s32.totalorder %s539_s15, 1  ;;  %p101_p3 = scmp.ne.s32.totalorder %s780_s10, %s776_s9 }
   0x8   : > { %s1030_s17 = smov (%p29_p0, %s27_s17), 0  ;;  %p102_p5 = scmp.eq.s32.totalorder %s540_s16, 1 }
   0x9   : > { %p857_p4 = por %p96_p2, %p95_p1  ;;  %s80_s20 = ssub.s32 %s792_s13, %s1030_s17 }
   0xa   : > { %p543_p6 = scmp.ge.s32.totalorder %s796_s14, 1  ;;  %p83_p7 = scmp.eq.s32.totalorder %s80_s20, 0 }
   0xb   : > { %p864_p8 = por %p102_p5, %p101_p3  ;;  %p136_p9 = scmp.lt.s32.totalorder %s796_s14, 3 }
   0xc   : > { %s870_s22 = scalar_select %p83_p7, %s784_s11, %s85_s18  }
   0xd   : > { %p137_p10 = pnand %p543_p6, %p136_p9 }
   0xe   : > { %v200_v0 = vld [vmem:[%s1020_s1] sm:$0xff] (!%p137_p10)  ;;  %v201_v1 = vld [vmem:[%s1020_s1 + $0x8] sm:$0xff] (!%p137_p10)  ;;  %v547_v2 = vld [vmem:[%s1020_s1 + $0x30] sm:$0xff] (!%p137_p10)  ;;  %v798_v3 = vmov (!%p137_p10), 0.0|0.0   ;;  %p163_p11 = scmp.lt.s32.totalorder (!%p137_p10), %s788_s12, 1  ;;  %vm799_vm0 = vmmov (!%p137_p10), 0  }
   0xf   : > { %140 = sbr.rel (%p137_p10) target bundleno = 279 (0x117), region = 28  ;;  %633 = vmatprep.subr.bf16.mxu0 (!%p137_p10), %v798_v3  ;;  %v634_v4 = vpack.c.bf16 (!%p137_p10), %v201_v1, %v200_v0  ;;  %642 = vmatprep.subr.bf16.mxu1 (!%p137_p10), %v798_v3  ;;  %v548_v5 = vld [vmem:[%s1020_s1 + $0x38] sm:$0xff] (!%p137_p10)  ;;  %v202_v6 = vld [vmem:[%s1020_s1 + $0x10] sm:$0xff] (!%p137_p10)  ;;  %v549_v9 = vld [vmem:[%s1020_s1 + $0x40] sm:$0xff] (!%p137_p10)  ;;  %v800_v11 = vmov (!%p137_p10), 0.0   ;;  %vm225_vm1 = vcmask (!%p137_p10), 1041409  }
  0x10   : > { %v203_v7 = vld [vmem:[%s1020_s1 + $0x18] sm:$0xff] (!%p137_p10)  ;;  %v643_v8 = vpack.c.bf16 (!%p137_p10), %v548_v5, %v547_v2  ;;  %v550_v10 = vld [vmem:[%s1020_s1 + $0x48] sm:$0xff] (!%p137_p10)  ;;  %600 = vmatprep.mubr.msk.f32.mxu0 (!%p137_p10), %vm799_vm0, %v800_v11  ;;  %615 = vmatprep.mubr.msk.f32.mxu1 (!%p137_p10), %vm799_vm0, %v800_v11  ;;  %v204_v14 = vld [vmem:[%s1020_s1 + $0x20] sm:$0xff] (!%p137_p10)  ;;  %vm228_vm2 = vcmask (!%p137_p10), 1042434   ;;  %vm231_vm3 = vcmask (!%p137_p10), 1043459   ;;  %vm233_vm4 = vcmask (!%p137_p10), 392192  }
  0x11   : > { %635 = vmatpush3.bf16.msra.mxu0 (!%p137_p10), %v634_v4  ;;  %v637_v12 = vpack.c.bf16 (!%p137_p10), %v203_v7, %v202_v6  ;;  %v646_v13 = vpack.c.bf16 (!%p137_p10), %v550_v10, %v549_v9  ;;  %v205_v15 = vld [vmem:[%s1020_s1 + $0x28] sm:$0xff] (!%p137_p10)  ;;  %v551_v16 = vld [vmem:[%s1020_s1 + $0x50] sm:$0xff] (!%p137_p10)  ;;  %v552_v17 = vld [vmem:[%s1020_s1 + $0x58] sm:$0xff] (!%p137_p10)  ;;  %s159_s28 = sand.u32 (!%p137_p10), 1, %s780_s10   ;;  %vm448_vm5 = vcmask (!%p137_p10), 125952  }
  0x12   : > { %644 = vmatpush3.bf16.msra.mxu1 (!%p137_p10), %v643_v8  ;;  %636 = vmatprep.subr.bf16.mxu0 (!%p137_p10), %v798_v3  ;;  %v640_v18 = vpack.c.bf16 (!%p137_p10), %v205_v15, %v204_v14  ;;  %v649_v22 = vpack.c.bf16 (!%p137_p10), %v552_v17, %v551_v16  ;;  %v553_v48 = vld [vmem:[%s1020_s1 + $0x60] sm:$0xff] (!%p137_p10)  ;;  %v554_v49 = vld [vmem:[%s1020_s1 + $0x68] sm:$0xff] (!%p137_p10)  ;;  %v555_v56 = vld [vmem:[%s1020_s1 + $0x70] sm:$0xff] (!%p137_p10)  ;;  %s544_s29 = sshll.u32 (!%p137_p10), %s159_s28, 2  ;;  %s451_s8 = scalar_lea.sflag (!%p137_p10), [#allocation3], %s159_s28 }
  0x13   : > { %645 = vmatprep.subr.bf16.mxu1 (!%p137_p10), %v798_v3  ;;  %v652_v54 = vpack.c.bf16 (!%p137_p10), %v554_v49, %v553_v48  ;;  %v556_v57 = vld [vmem:[%s1020_s1 + $0x78] sm:$0xff] (!%p137_p10)  ;;  %v557_v60 = vld [vmem:[%s1020_s1 + $0x80] sm:$0xff] (!%p137_p10)  ;;  %v558_v61 = vld [vmem:[%s1020_s1 + $0x88] sm:$0xff] (!%p137_p10)  ;;  %s161_s3 = scalar_lea.vmem (!%p137_p10), [#allocation2], %s544_s29 }
  0x14   : > { %v655_v59 = vpack.c.bf16 (!%p137_p10), %v556_v57, %v555_v56  ;;  %v658_v62 = vpack.c.bf16 (!%p137_p10), %v558_v61, %v557_v60  ;;  %s465_s4 = sshll.u32 (!%p137_p10), %s161_s3, 4  ;;  %s974_s4 = int_to_ptr.vmem [resolvable:$true] %s465_s4 }
  0x15   : > { %638 = vmatpush3.bf16.msra.mxu0 (!%p137_p10), %v637_v12  ;;  %s718_s15 = scalar_lea.vmem (!%p137_p10), %s974_s4, 64 }
  0x16   : > { %s164_s18 = scalar_select %p163_p11, %s788_s12, 1  ;;  %647 = vmatpush3.bf16.msra.mxu1 %v646_v13  ;;  %639 = vmatprep.subr.bf16.mxu0 %v798_v3 }
  0x17   : > { %648 = vmatprep.subr.bf16.mxu1 %v798_v3  ;;  %p719_p12 = scmp.ne.s32.totalorder %s974_s4, %s718_s15 }
  0x18   : > { %s566_s30 = sshll.u32 %s164_s18, 4 }
  0x19   : > { %s921_s5 = scalar_lea.vmem %s1019_s0, %s566_s30  ;;  %641 = vmatpush3.bf16.msra.mxu0 %v640_v18  ;;  %s563_s30 = sshll.u32 %s788_s12, 6 }
  0x1a   : > { %v172_v19 = vld [vmem:[%s921_s5] sm:$0x1]  ;;  %v173_v20 = vld [vmem:[%s921_s5 + $0x4] sm:$0x1]  ;;  %v174_v21 = vld [vmem:[%s921_s5 + $0x8] sm:$0x1]  ;;  %650 = vmatpush3.bf16.msra.mxu1 %v649_v22  ;;  %651 = vmatprep.subr.bf16.mxu0 %v798_v3  ;;  %s972_s7 = scalar_lea.hbm %s1021_s2, %s563_s30  ;;  %p720_p13 = pnand %p719_p12, %p857_p4 }
  0x1b   : > { %v175_v23 = vld [vmem:[%s921_s5 + $0xc] sm:$0x1]  ;;  %v176_v24 = vld [vmem:[%s921_s5 + $0x1] sm:$0x1]  ;;  %v177_v25 = vld [vmem:[%s921_s5 + $0x5] sm:$0x1] }
  0x1c   : > { %v178_v26 = vld [vmem:[%s921_s5 + $0x9] sm:$0x1]  ;;  %v179_v27 = vld [vmem:[%s921_s5 + $0xd] sm:$0x1]  ;;  %v180_v28 = vmax.f32 %v172_v19, %v176_v24  ;;  %v181_v29 = vmax.f32 %v173_v20, %v177_v25  ;;  %v184_v30 = vld [vmem:[%s921_s5 + $0x2] sm:$0x1]  ;;  %p721_p0 = pneg %p720_p13 }
  0x1d   : > { %v182_v31 = vmax.f32 %v174_v21, %v178_v26  ;;  %v183_v32 = vmax.f32 %v175_v23, %v179_v27  ;;  %v185_v33 = vld [vmem:[%s921_s5 + $0x6] sm:$0x1]  ;;  %v186_v34 = vld [vmem:[%s921_s5 + $0xa] sm:$0x1]  ;;  %v187_v35 = vld [vmem:[%s921_s5 + $0xe] sm:$0x1] }
  0x1e   : > { %v188_v36 = vmax.f32 %v180_v28, %v184_v30  ;;  %v189_v37 = vmax.f32 %v181_v29, %v185_v33  ;;  %v192_v38 = vld [vmem:[%s921_s5 + $0x3] sm:$0x1]  ;;  %v193_v39 = vld [vmem:[%s921_s5 + $0x7] sm:$0x1]  ;;  %v194_v40 = vld [vmem:[%s921_s5 + $0xb] sm:$0x1] }
  0x1f   : > { %v190_v41 = vmax.f32 %v182_v31, %v186_v34  ;;  %v191_v42 = vmax.f32 %v183_v32, %v187_v35  ;;  %v195_v43 = vld [vmem:[%s921_s5 + $0xf] sm:$0x1]  ;;  %s801_s12 = smov [#allocation2]  }
  0x20   : > { %v196_v44 = vmax.f32 %v188_v36, %v192_v38  ;;  %v197_v45 = vmax.f32 %v189_v37, %v193_v39  ;;  %s722_s16 = sshll.u32 %s801_s12, 4  ;;  %s723_s16 = int_to_ptr.vmem [resolvable:$false] %s722_s16 }
  0x21   : > { %v198_v46 = vmax.f32 %v190_v41, %v194_v40  ;;  %v199_v47 = vmax.f32 %v191_v42, %v195_v43  ;;  %s724_s18 = scalar_lea.vmem %s723_s16, 128  ;;  %p725_p1 = scmp.lt.s32.totalorder %s974_s4, %s723_s16 }
  0x22   : > { %v224_v50 = vrot.slane %v197_v45, 7  ;;  %p726_p2 = scmp.lt.s32.totalorder %s724_s18, %s718_s15 }
  0x23   : > { %v227_v51 = vrot.slane %v198_v46, 6  ;;  %v230_v52 = vrot.slane %v199_v47, 5 }
  0x24   : > { %v226_v53 = vsel %vm225_vm1, %v224_v50, %v196_v44  ;;  %p727_p3 = por %p726_p2, %p725_p1 }
  0x25   : > { %v229_v55 = vsel %vm228_vm2, %v227_v51, %v226_v53 }
  0x26   : > { %v232_v58 = vsel %vm231_vm3, %v230_v52, %v229_v55  ;;  %p728_p5 = pnand %p727_p3, %p721_p0 }
  0x27   : > { %601 = vmatmul.mubr.msk.f32.vlgmr.msra.gmra.mrb[0].mxu0 %vm233_vm4, %v232_v58  ;;  %616 = vmatmul.mubr.msk.f32.vlgmr.msra.gmra.mrb[0].mxu1 %vm233_vm4, %v232_v58 }
  0x28   : > { %653 = vmatpush3.bf16.msra.mxu0 %v652_v54  ;;  %630 = vmatprep.mubr.msk.f32.mxu0 %vm799_vm0, %v800_v11 }
  0x29   : > { %654 = vmatprep.subr.bf16.mxu0 %v798_v3 }
  0x2c   : > { %656 = vmatpush3.bf16.msra.mxu0 %v655_v59 }
  0x2d   : > { %657 = vmatprep.subr.bf16.mxu0 %v798_v3 }
  0x30   : > { %659 = vmatpush3.bf16.msra.mxu0 %v658_v62 }
  0x33   : > { %631 = vmatmul.mubr.msk.f32.vlgmr.msra.gmra.mrb[2].mxu0 %vm233_vm4, %v232_v58 }
  0xfa   : > { %v302_v63 = vpop.f32.mrb[0].mxu0  ;;  %v372_v0 = vpop.f32.mrb[0].mxu1 }
  0xfb   : > { %v376_v1 = vmax.f32 %v302_v63, %v372_v0  ;;  %v602_v2 = vpop.f32.mrb[1].mxu0  ;;  %v617_v4 = vpop.f32.mrb[1].mxu1 }
 0x106   : > { %v443_v5 = vpop.f32.mrb[2].mxu0 }
 0x107   : > { %v447_v6 = vmax.f32 %v376_v1, %v443_v5  ;;  %v632_v7 = vpop.f32.mrb[3].mxu0 }
 0x109   : > { %449 = vst.msk [vmem:[%s161_s3] sm:$0xf] %vm448_vm5, %v447_v6 }
 0x10a   : > { %731 = shalt.err (!%p728_p5)
}
 0x10b   : > { %s732_s20 = scalar_lea.hbm %s972_s7, 64  ;;  %s736_s25 = scalar_lea.hbm %s1021_s2, 128 }
 0x10c   : > { %p733_p6 = scmp.ne.s32.totalorder %s972_s7, %s732_s20  ;;  %p737_p10 = scmp.lt.u32.totalorder %s972_s7, %s1021_s2 }
 0x10d   : > { %p738_p11 = scmp.lt.u32.totalorder %s736_s25, %s732_s20  ;;  %p740_p13 = scmp.lt.u32.totalorder %s732_s20, %s972_s7 }
 0x10e   : > { %p734_p7 = pnand %p733_p6, %p857_p4 }
 0x10f   : > { %p739_p12 = por %p738_p11, %p737_p10 }
 0x110   : > { %p735_p9 = pneg %p734_p7 }
 0x111   : > { %p741_p0 = por %p740_p13, %p739_p12 }
 0x113   : > { %p742_p1 = pnand %p741_p0, %p735_p9 }
 0x115   : > { %745 = shalt.err (!%p742_p1)
}
 0x116   : > { %660 = dma.vmem_to_hbm [thread:$0]  (%p857_p4), %s974_s4, 64, %s972_s7, %s451_s8  }
 0x117 PF: > { %p666_p2 = scmp.ge.s32.totalorder %s796_s14, 2  ;;  %s477_s28 = sand.u32 1, %s776_s9  }
 0x118   : > { %s478_s29 = scalar_lea.sflag [#allocation3], %s477_s28 }
 0x119   : > { %p663_p3 = pnand %p666_p2, %p864_p8 }
 0x11b   : > { %771 = dma.done.wait (!%p663_p3), %s478_s29, 64  }
 0x11c   : > { %773 = vsyncadd (!%p663_p3), %s478_s29, 4294967232  ;;  %s15_s14 = sadd.s32 1, %s796_s14   ;;  %s1024_s9 = smov %s780_s10 }
 0x11d   : > { %p12_p5 = scmp.ge.s32.totalorder %s15_s14, 4   ;;  %s1025_s10 = smov %s784_s11 }
 0x11e   : > { %s1026_s11 = smov %s870_s22  ;;  %s1027_s12 = smov %s792_s13 }
 0x11f   : > { %s1028_s13 = smov %s1030_s17  ;;  %14 = sbr.rel (!%p12_p5) target bundleno = 4 (0x4), region = 65 }
 0x126   :  { %483 = vsyncpa [#allocation3], 1 }
 0x127   :  { %485 = vsyncpa [#allocation3 + $0x1], 1 }

</bundles_post_ra>
